<compile_context>
chip_gen: v7x
topology: tpu7x:2x2x1
jax: 0.10.0
libtpu: 0.0.40
codegen_flags: <defaults>
</compile_context>

<pallas_src>
import jax
import jax.numpy as jnp
from jax.experimental import pallas as pl
from jax.experimental.pallas import tpu as pltpu

VOCAB = 10
EMB_DIM = 6      # INPUT_SIZE
HIDDEN = 64
OUT1 = 32
OUT2 = 12
SUBLANE = 8      # pad batch to this many rows


def make_lstm_head_kernel(T, B, H):
    """Kernel closure over static T (seq len), B (padded batch), H (hidden).

    Refs:
      x_ref   : (T*B, E)  embedded inputs, time-major rows [t*B : (t+1)*B]
      wih_ref : (E, 4H)   input->gates weights, gate column order [i, f, o, g]
      whh_ref : (H, 4H)   hidden->gates weights, same gate order
      b_ref   : (1, 4H)   folded bias (b_ih + b_hh), same gate order
      wh_ref  : (H, 12)   fused head weight  (w_out @ w_out1)
      bh_ref  : (1, 12)   fused head bias    (b_out @ w_out1 + b_out1)
      out_ref : (B, 12)
      xw_ref  : (T*B, 4H) VMEM scratch holding the hoisted input projection
    """
    def kernel(x_ref, wih_ref, whh_ref, b_ref, wh_ref, bh_ref, out_ref, xw_ref):
        # --- hoisted input projection: one big matmul instead of T tiny ones ---
        xw_ref[...] = (jnp.dot(x_ref[...], wih_ref[...],
                               preferred_element_type=jnp.float32)
                       + b_ref[...])

        h = jnp.zeros((B, H), jnp.float32)
        c = jnp.zeros((B, H), jnp.float32)

        # --- fully unrolled recurrence: only h @ W_hh on the serial chain ---
        for t in range(T):
            z = xw_ref[t * B:(t + 1) * B, :] + jnp.dot(
                h, whh_ref[...], preferred_element_type=jnp.float32)   # (B, 4H)
            # gate order [i, f, o, g]: one sigmoid over 3H lanes, one tanh over H
            s = jax.nn.sigmoid(z[:, :3 * H])
            g = jnp.tanh(z[:, 3 * H:])
            i_g = s[:, 0 * H:1 * H]
            f_g = s[:, 1 * H:2 * H]
            o_g = s[:, 2 * H:3 * H]
            c = f_g * c + i_g * g
            h = o_g * jnp.tanh(c)

        # --- fused head: Linear(64,32) ∘ Linear(32,12) as one (64,12) matmul ---
        y = jnp.dot(h, wh_ref[...], preferred_element_type=jnp.float32) + bh_ref[...]
        out_ref[...] = y.astype(out_ref.dtype)

    return kernel


def init_params(key):
    ks = jax.random.split(key, 10)
    k_lstm = 1.0 / jnp.sqrt(jnp.float32(HIDDEN))
    k_out = 1.0 / jnp.sqrt(jnp.float32(HIDDEN))
    k_out1 = 1.0 / jnp.sqrt(jnp.float32(OUT1))

    # nn.Embedding default init: N(0, 1)
    embedding = jax.random.normal(ks[0], (VOCAB, EMB_DIM), jnp.float32)

    # LSTM weights stored transposed for x @ W; biases b_ih + b_hh folded.
    # PyTorch gate order is [i, f, g, o]; permute columns to [i, f, o, g] so the
    # kernel can apply a single sigmoid over the first 3H columns.
    w_ih = jax.random.uniform(ks[1], (EMB_DIM, 4 * HIDDEN), jnp.float32, -k_lstm, k_lstm)
    w_hh = jax.random.uniform(ks[2], (HIDDEN, 4 * HIDDEN), jnp.float32, -k_lstm, k_lstm)
    b_ih = jax.random.uniform(ks[3], (4 * HIDDEN,), jnp.float32, -k_lstm, k_lstm)
    b_hh = jax.random.uniform(ks[4], (4 * HIDDEN,), jnp.float32, -k_lstm, k_lstm)
    b = (b_ih + b_hh).reshape(1, 4 * HIDDEN)

    H = HIDDEN
    perm = jnp.concatenate([
        jnp.arange(0 * H, 1 * H),   # i
        jnp.arange(1 * H, 2 * H),   # f
        jnp.arange(3 * H, 4 * H),   # o
        jnp.arange(2 * H, 3 * H),   # g
    ])
    w_ih = w_ih[:, perm]
    w_hh = w_hh[:, perm]
    b = b[:, perm]

    # Head linears (no activation in between) -> fold into one weight/bias.
    w_out = jax.random.uniform(ks[5], (HIDDEN, OUT1), jnp.float32, -k_out, k_out)
    b_out = jax.random.uniform(ks[6], (OUT1,), jnp.float32, -k_out, k_out).reshape(1, OUT1)
    w_out1 = jax.random.uniform(ks[7], (OUT1, OUT2), jnp.float32, -k_out1, k_out1)
    b_out1 = jax.random.uniform(ks[8], (OUT2,), jnp.float32, -k_out1, k_out1).reshape(1, OUT2)

    w_head = w_out @ w_out1                   # (64, 12)
    b_head = b_out @ w_out1 + b_out1          # (1, 12)

    return dict(embedding=embedding, w_ih=w_ih, w_hh=w_hh, b=b,
                w_head=w_head, b_head=b_head)


def rnn_forward(x_tokens, params):
    B, T = x_tokens.shape

    # Embedding gather (glue): (B, T) int32 -> (B, T, E) float32
    x_emb = jnp.take(params["embedding"], x_tokens, axis=0)
    x_tbe = jnp.transpose(x_emb, (1, 0, 2))                     # (T, B, E)

    # Pad batch rows to the 8-sublane granularity (padded rows are dead work,
    # sliced off below), then flatten to time-major 2-D for the hoisted matmul.
    B_pad = max(SUBLANE, B)
    if B_pad % SUBLANE:
        B_pad += SUBLANE - B_pad % SUBLANE
    if B_pad != B:
        x_tbe = jnp.pad(x_tbe, ((0, 0), (0, B_pad - B), (0, 0)))
    x_2d = x_tbe.reshape(T * B_pad, EMB_DIM)                    # (T*B_pad, E)

    vmem = pl.BlockSpec(memory_space=pltpu.MemorySpace.VMEM)
    kernel = make_lstm_head_kernel(T, B_pad, HIDDEN)

    out = pl.pallas_call(
        kernel,
        out_shape=jax.ShapeDtypeStruct((B_pad, OUT2), jnp.float32),
        in_specs=[vmem] * 6,
        out_specs=vmem,
        scratch_shapes=[pltpu.VMEM((T * B_pad, 4 * HIDDEN), jnp.float32)],
    )(x_2d, params["w_ih"], params["w_hh"], params["b"],
      params["w_head"], params["b_head"])

    return out[:B]


if __name__ == "__main__":
    key = jax.random.PRNGKey(0)
    k_params, k_data = jax.random.split(key)

    params = init_params(k_params)

    # x: integer token ids (batch=2, seq=8) in [0, 10) — what nn.Embedding(10, 6) expects.
    x = jax.random.randint(k_data, (2, 8), 0, VOCAB, dtype=jnp.int32)

    out = rnn_forward(x, params)
    jax.block_until_ready(out)
    assert out.shape == (2, OUT2) and out.dtype == jnp.float32
    assert bool(jnp.all(jnp.isfinite(out)))
    print("KERNEL_OK")
</pallas_src>

<mosaic_0001>
module attributes {stable_mosaic.version = 11 : i64} {
  func.func @kernel(%arg0: memref<64x6xf32, #tpu.memory_space<vmem>>, %arg1: memref<6x256xf32, #tpu.memory_space<vmem>>, %arg2: memref<64x256xf32, #tpu.memory_space<vmem>>, %arg3: memref<1x256xf32, #tpu.memory_space<vmem>>, %arg4: memref<64x12xf32, #tpu.memory_space<vmem>>, %arg5: memref<1x12xf32, #tpu.memory_space<vmem>>, %arg6: memref<8x12xf32, #tpu.memory_space<vmem>>, %arg7: memref<64x256xf32, #tpu.memory_space<vmem>>) attributes {dimension_semantics = [], scalar_prefetch = 0 : i64, scratch_operands = 1 : i64, tpu.core_type = #tpu.core_type<tc>} {
    %c0 = arith.constant 0 : index
    %c0_0 = arith.constant 0 : index
    %0 = vector.load %arg0[%c0, %c0_0] : memref<64x6xf32, #tpu.memory_space<vmem>>, vector<64x6xf32>
    %c0_1 = arith.constant 0 : index
    %c0_2 = arith.constant 0 : index
    %1 = vector.load %arg1[%c0_1, %c0_2] : memref<6x256xf32, #tpu.memory_space<vmem>>, vector<6x256xf32>
    %cst = arith.constant dense<0.000000e+00> : vector<64x256xf32>
    %2 = tpu.matmul %0, %1, %cst {dimension_numbers = #tpu.dot_dimension_numbers<[1], [0], [0], [1], [0, 0, 1, 1], [], []>} : vector<64x6xf32>, vector<6x256xf32>, vector<64x256xf32> -> vector<64x256xf32>
    %c0_3 = arith.constant 0 : index
    %c0_4 = arith.constant 0 : index
    %3 = vector.load %arg3[%c0_3, %c0_4] : memref<1x256xf32, #tpu.memory_space<vmem>>, vector<1x256xf32>
    %4 = vector.broadcast %3 : vector<1x256xf32> to vector<64x256xf32>
    %5 = arith.addf %2, %4 : vector<64x256xf32>
    %c0_5 = arith.constant 0 : index
    %c0_6 = arith.constant 0 : index
    %6 = vector.load %arg7[%c0_5, %c0_6] : memref<64x256xf32, #tpu.memory_space<vmem>>, vector<64x256xf32>
    tpu.vector_store %arg7[%c0_5, %c0_6], %5 {strides = array<i32>} : memref<64x256xf32, #tpu.memory_space<vmem>>, vector<64x256xf32>,
    %cst_7 = arith.constant 0.000000e+00 : f32
    %7 = vector.broadcast %cst_7 : f32 to vector<8x64xf32>
    %cst_8 = arith.constant 0.000000e+00 : f32
    %8 = vector.broadcast %cst_8 : f32 to vector<8x64xf32>
    %c0_9 = arith.constant 0 : index
    %c0_10 = arith.constant 0 : index
    %9 = vector.load %arg7[%c0_9, %c0_10] : memref<64x256xf32, #tpu.memory_space<vmem>>, vector<8x256xf32>
    %c0_11 = arith.constant 0 : index
    %c0_12 = arith.constant 0 : index
    %10 = vector.load %arg2[%c0_11, %c0_12] : memref<64x256xf32, #tpu.memory_space<vmem>>, vector<64x256xf32>
    %cst_13 = arith.constant dense<0.000000e+00> : vector<8x256xf32>
    %11 = tpu.matmul %7, %10, %cst_13 {dimension_numbers = #tpu.dot_dimension_numbers<[1], [0], [0], [1], [0, 0, 1, 1], [], []>} : vector<8x64xf32>, vector<64x256xf32>, vector<8x256xf32> -> vector<8x256xf32>
    %12 = arith.addf %9, %11 : vector<8x256xf32>
    %13 = vector.extract_strided_slice %12 {offsets = [0, 0], sizes = [8, 192], strides = [1, 1]} : vector<8x256xf32> to vector<8x192xf32>
    %14 = arith.negf %13 : vector<8x192xf32>
    %15 = math.exp %14 : vector<8x192xf32>
    %cst_14 = arith.constant 1.000000e+00 : f32
    %16 = vector.broadcast %cst_14 : f32 to vector<8x192xf32>
    %17 = arith.addf %16, %15 : vector<8x192xf32>
    %18 = arith.divf %16, %17 : vector<8x192xf32>
    %19 = vector.extract_strided_slice %12 {offsets = [0, 192], sizes = [8, 64], strides = [1, 1]} : vector<8x256xf32> to vector<8x64xf32>
    %20 = math.tanh %19 : vector<8x64xf32>
    %21 = vector.extract_strided_slice %18 {offsets = [0, 0], sizes = [8, 64], strides = [1, 1]} : vector<8x192xf32> to vector<8x64xf32>
    %22 = vector.extract_strided_slice %18 {offsets = [0, 64], sizes = [8, 64], strides = [1, 1]} : vector<8x192xf32> to vector<8x64xf32>
    %23 = vector.extract_strided_slice %18 {offsets = [0, 128], sizes = [8, 64], strides = [1, 1]} : vector<8x192xf32> to vector<8x64xf32>
    %24 = arith.mulf %22, %8 : vector<8x64xf32>
    %25 = arith.mulf %21, %20 : vector<8x64xf32>
    %26 = arith.addf %24, %25 : vector<8x64xf32>
    %27 = math.tanh %26 : vector<8x64xf32>
    %28 = arith.mulf %23, %27 : vector<8x64xf32>
    %c8 = arith.constant 8 : index
    %c0_15 = arith.constant 0 : index
    %29 = vector.load %arg7[%c8, %c0_15] : memref<64x256xf32, #tpu.memory_space<vmem>>, vector<8x256xf32>
    %c0_16 = arith.constant 0 : index
    %c0_17 = arith.constant 0 : index
    %30 = vector.load %arg2[%c0_16, %c0_17] : memref<64x256xf32, #tpu.memory_space<vmem>>, vector<64x256xf32>
    %cst_18 = arith.constant dense<0.000000e+00> : vector<8x256xf32>
    %31 = tpu.matmul %28, %30, %cst_18 {dimension_numbers = #tpu.dot_dimension_numbers<[1], [0], [0], [1], [0, 0, 1, 1], [], []>} : vector<8x64xf32>, vector<64x256xf32>, vector<8x256xf32> -> vector<8x256xf32>
    %32 = arith.addf %29, %31 : vector<8x256xf32>
    %33 = vector.extract_strided_slice %32 {offsets = [0, 0], sizes = [8, 192], strides = [1, 1]} : vector<8x256xf32> to vector<8x192xf32>
    %34 = arith.negf %33 : vector<8x192xf32>
    %35 = math.exp %34 : vector<8x192xf32>
    %cst_19 = arith.constant 1.000000e+00 : f32
    %36 = vector.broadcast %cst_19 : f32 to vector<8x192xf32>
    %37 = arith.addf %36, %35 : vector<8x192xf32>
    %38 = arith.divf %36, %37 : vector<8x192xf32>
    %39 = vector.extract_strided_slice %32 {offsets = [0, 192], sizes = [8, 64], strides = [1, 1]} : vector<8x256xf32> to vector<8x64xf32>
    %40 = math.tanh %39 : vector<8x64xf32>
    %41 = vector.extract_strided_slice %38 {offsets = [0, 0], sizes = [8, 64], strides = [1, 1]} : vector<8x192xf32> to vector<8x64xf32>
    %42 = vector.extract_strided_slice %38 {offsets = [0, 64], sizes = [8, 64], strides = [1, 1]} : vector<8x192xf32> to vector<8x64xf32>
    %43 = vector.extract_strided_slice %38 {offsets = [0, 128], sizes = [8, 64], strides = [1, 1]} : vector<8x192xf32> to vector<8x64xf32>
    %44 = arith.mulf %42, %26 : vector<8x64xf32>
    %45 = arith.mulf %41, %40 : vector<8x64xf32>
    %46 = arith.addf %44, %45 : vector<8x64xf32>
    %47 = math.tanh %46 : vector<8x64xf32>
    %48 = arith.mulf %43, %47 : vector<8x64xf32>
    %c16 = arith.constant 16 : index
    %c0_20 = arith.constant 0 : index
    %49 = vector.load %arg7[%c16, %c0_20] : memref<64x256xf32, #tpu.memory_space<vmem>>, vector<8x256xf32>
    %c0_21 = arith.constant 0 : index
    %c0_22 = arith.constant 0 : index
    %50 = vector.load %arg2[%c0_21, %c0_22] : memref<64x256xf32, #tpu.memory_space<vmem>>, vector<64x256xf32>
    %cst_23 = arith.constant dense<0.000000e+00> : vector<8x256xf32>
    %51 = tpu.matmul %48, %50, %cst_23 {dimension_numbers = #tpu.dot_dimension_numbers<[1], [0], [0], [1], [0, 0, 1, 1], [], []>} : vector<8x64xf32>, vector<64x256xf32>, vector<8x256xf32> -> vector<8x256xf32>
    %52 = arith.addf %49, %51 : vector<8x256xf32>
    %53 = vector.extract_strided_slice %52 {offsets = [0, 0], sizes = [8, 192], strides = [1, 1]} : vector<8x256xf32> to vector<8x192xf32>
    %54 = arith.negf %53 : vector<8x192xf32>
    %55 = math.exp %54 : vector<8x192xf32>
    %cst_24 = arith.constant 1.000000e+00 : f32
    %56 = vector.broadcast %cst_24 : f32 to vector<8x192xf32>
    %57 = arith.addf %56, %55 : vector<8x192xf32>
    %58 = arith.divf %56, %57 : vector<8x192xf32>
    %59 = vector.extract_strided_slice %52 {offsets = [0, 192], sizes = [8, 64], strides = [1, 1]} : vector<8x256xf32> to vector<8x64xf32>
    %60 = math.tanh %59 : vector<8x64xf32>
    %61 = vector.extract_strided_slice %58 {offsets = [0, 0], sizes = [8, 64], strides = [1, 1]} : vector<8x192xf32> to vector<8x64xf32>
    %62 = vector.extract_strided_slice %58 {offsets = [0, 64], sizes = [8, 64], strides = [1, 1]} : vector<8x192xf32> to vector<8x64xf32>
    %63 = vector.extract_strided_slice %58 {offsets = [0, 128], sizes = [8, 64], strides = [1, 1]} : vector<8x192xf32> to vector<8x64xf32>
    %64 = arith.mulf %62, %46 : vector<8x64xf32>
    %65 = arith.mulf %61, %60 : vector<8x64xf32>
    %66 = arith.addf %64, %65 : vector<8x64xf32>
    %67 = math.tanh %66 : vector<8x64xf32>
    %68 = arith.mulf %63, %67 : vector<8x64xf32>
    %c24 = arith.constant 24 : index
    %c0_25 = arith.constant 0 : index
    %69 = vector.load %arg7[%c24, %c0_25] : memref<64x256xf32, #tpu.memory_space<vmem>>, vector<8x256xf32>
    %c0_26 = arith.constant 0 : index
    %c0_27 = arith.constant 0 : index
    %70 = vector.load %arg2[%c0_26, %c0_27] : memref<64x256xf32, #tpu.memory_space<vmem>>, vector<64x256xf32>
    %cst_28 = arith.constant dense<0.000000e+00> : vector<8x256xf32>
    %71 = tpu.matmul %68, %70, %cst_28 {dimension_numbers = #tpu.dot_dimension_numbers<[1], [0], [0], [1], [0, 0, 1, 1], [], []>} : vector<8x64xf32>, vector<64x256xf32>, vector<8x256xf32> -> vector<8x256xf32>
    %72 = arith.addf %69, %71 : vector<8x256xf32>
    %73 = vector.extract_strided_slice %72 {offsets = [0, 0], sizes = [8, 192], strides = [1, 1]} : vector<8x256xf32> to vector<8x192xf32>
    %74 = arith.negf %73 : vector<8x192xf32>
    %75 = math.exp %74 : vector<8x192xf32>
    %cst_29 = arith.constant 1.000000e+00 : f32
    %76 = vector.broadcast %cst_29 : f32 to vector<8x192xf32>
    %77 = arith.addf %76, %75 : vector<8x192xf32>
    %78 = arith.divf %76, %77 : vector<8x192xf32>
    %79 = vector.extract_strided_slice %72 {offsets = [0, 192], sizes = [8, 64], strides = [1, 1]} : vector<8x256xf32> to vector<8x64xf32>
    %80 = math.tanh %79 : vector<8x64xf32>
    %81 = vector.extract_strided_slice %78 {offsets = [0, 0], sizes = [8, 64], strides = [1, 1]} : vector<8x192xf32> to vector<8x64xf32>
    %82 = vector.extract_strided_slice %78 {offsets = [0, 64], sizes = [8, 64], strides = [1, 1]} : vector<8x192xf32> to vector<8x64xf32>
    %83 = vector.extract_strided_slice %78 {offsets = [0, 128], sizes = [8, 64], strides = [1, 1]} : vector<8x192xf32> to vector<8x64xf32>
    %84 = arith.mulf %82, %66 : vector<8x64xf32>
    %85 = arith.mulf %81, %80 : vector<8x64xf32>
    %86 = arith.addf %84, %85 : vector<8x64xf32>
    %87 = math.tanh %86 : vector<8x64xf32>
    %88 = arith.mulf %83, %87 : vector<8x64xf32>
    %c32 = arith.constant 32 : index
    %c0_30 = arith.constant 0 : index
    %89 = vector.load %arg7[%c32, %c0_30] : memref<64x256xf32, #tpu.memory_space<vmem>>, vector<8x256xf32>
    %c0_31 = arith.constant 0 : index
    %c0_32 = arith.constant 0 : index
    %90 = vector.load %arg2[%c0_31, %c0_32] : memref<64x256xf32, #tpu.memory_space<vmem>>, vector<64x256xf32>
    %cst_33 = arith.constant dense<0.000000e+00> : vector<8x256xf32>
    %91 = tpu.matmul %88, %90, %cst_33 {dimension_numbers = #tpu.dot_dimension_numbers<[1], [0], [0], [1], [0, 0, 1, 1], [], []>} : vector<8x64xf32>, vector<64x256xf32>, vector<8x256xf32> -> vector<8x256xf32>
    %92 = arith.addf %89, %91 : vector<8x256xf32>
    %93 = vector.extract_strided_slice %92 {offsets = [0, 0], sizes = [8, 192], strides = [1, 1]} : vector<8x256xf32> to vector<8x192xf32>
    %94 = arith.negf %93 : vector<8x192xf32>
    %95 = math.exp %94 : vector<8x192xf32>
    %cst_34 = arith.constant 1.000000e+00 : f32
    %96 = vector.broadcast %cst_34 : f32 to vector<8x192xf32>
    %97 = arith.addf %96, %95 : vector<8x192xf32>
    %98 = arith.divf %96, %97 : vector<8x192xf32>
    %99 = vector.extract_strided_slice %92 {offsets = [0, 192], sizes = [8, 64], strides = [1, 1]} : vector<8x256xf32> to vector<8x64xf32>
    %100 = math.tanh %99 : vector<8x64xf32>
    %101 = vector.extract_strided_slice %98 {offsets = [0, 0], sizes = [8, 64], strides = [1, 1]} : vector<8x192xf32> to vector<8x64xf32>
    %102 = vector.extract_strided_slice %98 {offsets = [0, 64], sizes = [8, 64], strides = [1, 1]} : vector<8x192xf32> to vector<8x64xf32>
    %103 = vector.extract_strided_slice %98 {offsets = [0, 128], sizes = [8, 64], strides = [1, 1]} : vector<8x192xf32> to vector<8x64xf32>
    %104 = arith.mulf %102, %86 : vector<8x64xf32>
    %105 = arith.mulf %101, %100 : vector<8x64xf32>
    %106 = arith.addf %104, %105 : vector<8x64xf32>
    %107 = math.tanh %106 : vector<8x64xf32>
    %108 = arith.mulf %103, %107 : vector<8x64xf32>
    %c40 = arith.constant 40 : index
    %c0_35 = arith.constant 0 : index
    %109 = vector.load %arg7[%c40, %c0_35] : memref<64x256xf32, #tpu.memory_space<vmem>>, vector<8x256xf32>
    %c0_36 = arith.constant 0 : index
    %c0_37 = arith.constant 0 : index
    %110 = vector.load %arg2[%c0_36, %c0_37] : memref<64x256xf32, #tpu.memory_space<vmem>>, vector<64x256xf32>
    %cst_38 = arith.constant dense<0.000000e+00> : vector<8x256xf32>
    %111 = tpu.matmul %108, %110, %cst_38 {dimension_numbers = #tpu.dot_dimension_numbers<[1], [0], [0], [1], [0, 0, 1, 1], [], []>} : vector<8x64xf32>, vector<64x256xf32>, vector<8x256xf32> -> vector<8x256xf32>
    %112 = arith.addf %109, %111 : vector<8x256xf32>
    %113 = vector.extract_strided_slice %112 {offsets = [0, 0], sizes = [8, 192], strides = [1, 1]} : vector<8x256xf32> to vector<8x192xf32>
    %114 = arith.negf %113 : vector<8x192xf32>
    %115 = math.exp %114 : vector<8x192xf32>
    %cst_39 = arith.constant 1.000000e+00 : f32
    %116 = vector.broadcast %cst_39 : f32 to vector<8x192xf32>
    %117 = arith.addf %116, %115 : vector<8x192xf32>
    %118 = arith.divf %116, %117 : vector<8x192xf32>
    %119 = vector.extract_strided_slice %112 {offsets = [0, 192], sizes = [8, 64], strides = [1, 1]} : vector<8x256xf32> to vector<8x64xf32>
    %120 = math.tanh %119 : vector<8x64xf32>
    %121 = vector.extract_strided_slice %118 {offsets = [0, 0], sizes = [8, 64], strides = [1, 1]} : vector<8x192xf32> to vector<8x64xf32>
    %122 = vector.extract_strided_slice %118 {offsets = [0, 64], sizes = [8, 64], strides = [1, 1]} : vector<8x192xf32> to vector<8x64xf32>
    %123 = vector.extract_strided_slice %118 {offsets = [0, 128], sizes = [8, 64], strides = [1, 1]} : vector<8x192xf32> to vector<8x64xf32>
    %124 = arith.mulf %122, %106 : vector<8x64xf32>
    %125 = arith.mulf %121, %120 : vector<8x64xf32>
    %126 = arith.addf %124, %125 : vector<8x64xf32>
    %127 = math.tanh %126 : vector<8x64xf32>
    %128 = arith.mulf %123, %127 : vector<8x64xf32>
    %c48 = arith.constant 48 : index
    %c0_40 = arith.constant 0 : index
    %129 = vector.load %arg7[%c48, %c0_40] : memref<64x256xf32, #tpu.memory_space<vmem>>, vector<8x256xf32>
    %c0_41 = arith.constant 0 : index
    %c0_42 = arith.constant 0 : index
    %130 = vector.load %arg2[%c0_41, %c0_42] : memref<64x256xf32, #tpu.memory_space<vmem>>, vector<64x256xf32>
    %cst_43 = arith.constant dense<0.000000e+00> : vector<8x256xf32>
    %131 = tpu.matmul %128, %130, %cst_43 {dimension_numbers = #tpu.dot_dimension_numbers<[1], [0], [0], [1], [0, 0, 1, 1], [], []>} : vector<8x64xf32>, vector<64x256xf32>, vector<8x256xf32> -> vector<8x256xf32>
    %132 = arith.addf %129, %131 : vector<8x256xf32>
    %133 = vector.extract_strided_slice %132 {offsets = [0, 0], sizes = [8, 192], strides = [1, 1]} : vector<8x256xf32> to vector<8x192xf32>
    %134 = arith.negf %133 : vector<8x192xf32>
    %135 = math.exp %134 : vector<8x192xf32>
    %cst_44 = arith.constant 1.000000e+00 : f32
    %136 = vector.broadcast %cst_44 : f32 to vector<8x192xf32>
    %137 = arith.addf %136, %135 : vector<8x192xf32>
    %138 = arith.divf %136, %137 : vector<8x192xf32>
    %139 = vector.extract_strided_slice %132 {offsets = [0, 192], sizes = [8, 64], strides = [1, 1]} : vector<8x256xf32> to vector<8x64xf32>
    %140 = math.tanh %139 : vector<8x64xf32>
    %141 = vector.extract_strided_slice %138 {offsets = [0, 0], sizes = [8, 64], strides = [1, 1]} : vector<8x192xf32> to vector<8x64xf32>
    %142 = vector.extract_strided_slice %138 {offsets = [0, 64], sizes = [8, 64], strides = [1, 1]} : vector<8x192xf32> to vector<8x64xf32>
    %143 = vector.extract_strided_slice %138 {offsets = [0, 128], sizes = [8, 64], strides = [1, 1]} : vector<8x192xf32> to vector<8x64xf32>
    %144 = arith.mulf %142, %126 : vector<8x64xf32>
    %145 = arith.mulf %141, %140 : vector<8x64xf32>
    %146 = arith.addf %144, %145 : vector<8x64xf32>
    %147 = math.tanh %146 : vector<8x64xf32>
    %148 = arith.mulf %143, %147 : vector<8x64xf32>
    %c56 = arith.constant 56 : index
    %c0_45 = arith.constant 0 : index
    %149 = vector.load %arg7[%c56, %c0_45] : memref<64x256xf32, #tpu.memory_space<vmem>>, vector<8x256xf32>
    %c0_46 = arith.constant 0 : index
    %c0_47 = arith.constant 0 : index
    %150 = vector.load %arg2[%c0_46, %c0_47] : memref<64x256xf32, #tpu.memory_space<vmem>>, vector<64x256xf32>
    %cst_48 = arith.constant dense<0.000000e+00> : vector<8x256xf32>
    %151 = tpu.matmul %148, %150, %cst_48 {dimension_numbers = #tpu.dot_dimension_numbers<[1], [0], [0], [1], [0, 0, 1, 1], [], []>} : vector<8x64xf32>, vector<64x256xf32>, vector<8x256xf32> -> vector<8x256xf32>
    %152 = arith.addf %149, %151 : vector<8x256xf32>
    %153 = vector.extract_strided_slice %152 {offsets = [0, 0], sizes = [8, 192], strides = [1, 1]} : vector<8x256xf32> to vector<8x192xf32>
    %154 = arith.negf %153 : vector<8x192xf32>
    %155 = math.exp %154 : vector<8x192xf32>
    %cst_49 = arith.constant 1.000000e+00 : f32
    %156 = vector.broadcast %cst_49 : f32 to vector<8x192xf32>
    %157 = arith.addf %156, %155 : vector<8x192xf32>
    %158 = arith.divf %156, %157 : vector<8x192xf32>
    %159 = vector.extract_strided_slice %152 {offsets = [0, 192], sizes = [8, 64], strides = [1, 1]} : vector<8x256xf32> to vector<8x64xf32>
    %160 = math.tanh %159 : vector<8x64xf32>
    %161 = vector.extract_strided_slice %158 {offsets = [0, 0], sizes = [8, 64], strides = [1, 1]} : vector<8x192xf32> to vector<8x64xf32>
    %162 = vector.extract_strided_slice %158 {offsets = [0, 64], sizes = [8, 64], strides = [1, 1]} : vector<8x192xf32> to vector<8x64xf32>
    %163 = vector.extract_strided_slice %158 {offsets = [0, 128], sizes = [8, 64], strides = [1, 1]} : vector<8x192xf32> to vector<8x64xf32>
    %164 = arith.mulf %162, %146 : vector<8x64xf32>
    %165 = arith.mulf %161, %160 : vector<8x64xf32>
    %166 = arith.addf %164, %165 : vector<8x64xf32>
    %167 = math.tanh %166 : vector<8x64xf32>
    %168 = arith.mulf %163, %167 : vector<8x64xf32>
    %c0_50 = arith.constant 0 : index
    %c0_51 = arith.constant 0 : index
    %169 = vector.load %arg4[%c0_50, %c0_51] : memref<64x12xf32, #tpu.memory_space<vmem>>, vector<64x12xf32>
    %cst_52 = arith.constant dense<0.000000e+00> : vector<8x12xf32>
    %170 = tpu.matmul %168, %169, %cst_52 {dimension_numbers = #tpu.dot_dimension_numbers<[1], [0], [0], [1], [0, 0, 1, 1], [], []>} : vector<8x64xf32>, vector<64x12xf32>, vector<8x12xf32> -> vector<8x12xf32>
    %c0_53 = arith.constant 0 : index
    %c0_54 = arith.constant 0 : index
    %171 = vector.load %arg5[%c0_53, %c0_54] : memref<1x12xf32, #tpu.memory_space<vmem>>, vector<1x12xf32>
    %172 = vector.broadcast %171 : vector<1x12xf32> to vector<8x12xf32>
    %173 = arith.addf %170, %172 : vector<8x12xf32>
    %c0_55 = arith.constant 0 : index
    %c0_56 = arith.constant 0 : index
    %174 = vector.load %arg6[%c0_55, %c0_56] : memref<8x12xf32, #tpu.memory_space<vmem>>, vector<8x12xf32>
    tpu.vector_store %arg6[%c0_55, %c0_56], %173 {strides = array<i32>} : memref<8x12xf32, #tpu.memory_space<vmem>>, vector<8x12xf32>,
    return
  }
}

</mosaic_0001>

<bundles_post_ra>
// kernel: tpu_custom_call.1
= control target key start
LH: loop header
LB: loop body
LE: loop exit
PB: predicated region body
PF: predicated region fallthrough
CT: control target
= control target key end

     0   :  { %vm71_vm0 = vcmask 1045504   ;;  %v1552_v2 = vmov 0.0   ;;  %vm46_vm1 = vcmask 48128   ;;  %s1900_s0 = inlined_call_operand.vmem [shape: f32[64,6], index: 0, kind: input, shape index: {}]   ;;  %s1901_s1 = inlined_call_operand.vmem [shape: f32[6,256], index: 1, kind: input, shape index: {}]   ;;  %s1902_s2 = inlined_call_operand.vmem [shape: f32[64,256], index: 2, kind: input, shape index: {}]   ;;  %s1903_s3 = inlined_call_operand.vmem [shape: f32[1,256], index: 3, kind: input, shape index: {}]   ;;  %s1904_s4 = inlined_call_operand.vmem [shape: f32[64,12], index: 4, kind: input, shape index: {}]   ;;  %s1905_s5 = inlined_call_operand.vmem [shape: f32[1,12], index: 5, kind: input, shape index: {}]   ;;  %s1906_s6 = inlined_call_operand.hbm [shape: f32[8,12], index: 6, kind: output, shape index: {}]  }
   0x1   :  { %v33_v0 = vld [vmem:[%s1901_s1 + $0x8] sm:$0x3f]  ;;  %v32_v1 = vld [vmem:[%s1901_s1] sm:$0x3f]  ;;  %142 = vmatprep.mubr.f32.mxu1 %v1552_v2  ;;  %v212_v5 = vld [vmem:[%s1902_s2 + $0x18] sm:$0xff]  ;;  %617 = vmatprep.mubr.f32.mxu0 %v1552_v2 }
   0x2   :  { %1192 = vmatprep.subr.msk.mxu1 %vm71_vm0, %v33_v0  ;;  %v24_v3 = vld [vmem:[%s1900_s0] sm:$0xff]  ;;  %v210_v4 = vld [vmem:[%s1902_s2 + $0x8] sm:$0xff]  ;;  %v211_v8 = vld [vmem:[%s1902_s2 + $0x10] sm:$0xff] }
   0x3   :  { %1193 = vmatpush1.msk.msra.mxu1 %vm71_vm0, %v32_v1  ;;  %v1608_v6 = vpack.c.bf16 %v212_v5, %v210_v4  ;;  %v209_v7 = vld [vmem:[%s1902_s2] sm:$0xff]  ;;  %v214_v10 = vld [vmem:[%s1902_s2 + $0x28] sm:$0xff]  ;;  %v216_v11 = vld [vmem:[%s1902_s2 + $0x38] sm:$0xff] }
   0x4   :  { %1194 = vmatmul.mubr.msk.f32.vlgmr.msra.gmra.mrb[0].mxu1 %vm46_vm1, %v24_v3  ;;  %v1618_v9 = vpack.c.bf16 %v211_v8, %v209_v7  ;;  %v25_v12 = vld [vmem:[%s1900_s0 + $0x8] sm:$0xff]  ;;  %v1631_v13 = vpack.c.bf16 %v216_v11, %v214_v10  ;;  %v213_v14 = vld [vmem:[%s1902_s2 + $0x20] sm:$0xff]  ;;  %v215_v15 = vld [vmem:[%s1902_s2 + $0x30] sm:$0xff] }
   0x5   :  { %1256 = vmatprep.subr.bf16.mxu1 %v1608_v6  ;;  %148 = vmatprep.mubr.f32.mxu1 %v1552_v2  ;;  %v1640_v16 = vpack.c.bf16 %v215_v15, %v213_v14  ;;  %v218_v17 = vld [vmem:[%s1902_s2 + $0x48] sm:$0xff]  ;;  %v220_v18 = vld [vmem:[%s1902_s2 + $0x58] sm:$0xff]  ;;  %v217_v20 = vld [vmem:[%s1902_s2 + $0x40] sm:$0xff] }
   0x6   :  { %1258 = vmatpush1.bf16.msra.mxu1 %v1618_v9  ;;  %1304 = vmatprep.subr.bf16.mxu0 %v1608_v6  ;;  %v1650_v19 = vpack.c.bf16 %v220_v18, %v218_v17  ;;  %v219_v21 = vld [vmem:[%s1902_s2 + $0x50] sm:$0xff]  ;;  %v222_v22 = vld [vmem:[%s1902_s2 + $0x68] sm:$0xff]  ;;  %v224_v23 = vld [vmem:[%s1902_s2 + $0x78] sm:$0xff] }
   0x7   :  { %1260 = vmatprep.subr.bf16.mxu1 %v1631_v13  ;;  %1306 = vmatpush1.bf16.msra.mxu0 %v1618_v9  ;;  %v26_v24 = vld [vmem:[%s1900_s0 + $0x10] sm:$0xff]  ;;  %v1672_v25 = vpack.c.bf16 %v219_v21, %v217_v20 }
   0x8   :  { %1195 = vmatmul.mubr.msk.f32.gmra.mrb[2].mxu1 %vm46_vm1, %v25_v12  ;;  %1308 = vmatprep.subr.bf16.mxu0 %v1631_v13 }
   0x9   :  { %154 = vmatprep.mubr.f32.mxu1 %v1552_v2 }
   0xa   :  { %1262 = vmatpush1.bf16.msra.mxu1 %v1640_v16 }
   0xb   :  { %11 = vsyncpa [#allocation4], 0  ;;  %1264 = vmatprep.subr.bf16.mxu1 %v1650_v19  ;;  %v1675_v26 = vpack.c.bf16 %v224_v23, %v222_v22  ;;  %v221_v27 = vld [vmem:[%s1902_s2 + $0x60] sm:$0xff]  ;;  %v223_v28 = vld [vmem:[%s1902_s2 + $0x70] sm:$0xff]  ;;  %1310 = vmatpush1.bf16.msra.mxu0 %v1640_v16  ;;  %v36_v39 = vlaneseq  ;;  %s1553_s23 = smov 64   ;;  %vm225_vm2 = vcmask 523264  }
   0xc   :  { %1196 = vmatmul.mubr.msk.f32.gmra.mrb[4].mxu1 %vm46_vm1, %v26_v24  ;;  %1312 = vmatprep.subr.bf16.mxu0 %v1650_v19  ;;  %v27_v29 = vld [vmem:[%s1900_s0 + $0x18] sm:$0xff]  ;;  %v1691_v30 = vpack.c.bf16 %v223_v28, %v221_v27  ;;  %v28_v31 = vld [vmem:[%s1900_s0 + $0x20] sm:$0xff]  ;;  %v29_v32 = vld [vmem:[%s1900_s0 + $0x28] sm:$0xff]  ;;  %vm1555_vm3 = vmmov 0   ;;  %s1556_s2 = smov [#allocation3]   ;;  %vm1176_vm4 = vcmask 97280  }
   0xd   :  { %160 = vmatprep.mubr.f32.mxu1 %v1552_v2  ;;  %v30_v33 = vld [vmem:[%s1900_s0 + $0x30] sm:$0xff]  ;;  %v31_v34 = vld [vmem:[%s1900_s0 + $0x38] sm:$0xff]  ;;  %v37_v42 = vshrl.u32 %v36_v39, 7  ;;  %v34_v47 = vld [vmem:[%s1903_s3] sm:$0x3]  ;;  %s1184_s15 = sshll.u32 %s1556_s2, 4  ;;  %s1185_s15 = int_to_ptr.vmem [resolvable:$true] %s1184_s15 }
   0xe   :  { %1266 = vmatpush1.bf16.msra.mxu1 %v1672_v25  ;;  %s1528_s16 = scalar_lea.vmem %s1185_s15, 128  ;;  %p1533_p1 = scmp.lt.s32.totalorder %s1185_s15, %s1185_s15 }
   0xf   :  { %1268 = vmatprep.subr.bf16.mxu1 %v1675_v26  ;;  %1314 = vmatpush1.bf16.msra.mxu0 %v1672_v25  ;;  %v42_v45 = vsub.s32 1, %v37_v42  ;;  %v38_v54 = vsub.s32 0, %v37_v42  ;;  %p1529_p0 = scmp.ne.s32.totalorder %s1185_s15, %s1528_s16  ;;  %p1534_p2 = scmp.lt.s32.totalorder %s1528_s16, %s1528_s16 }
  0x10   :  { %1197 = vmatmul.mubr.msk.f32.gmra.mrb[6].mxu1 %vm46_vm1, %v27_v29  ;;  %1316 = vmatprep.subr.bf16.mxu0 %v1675_v26 }
  0x11   :  { %166 = vmatprep.mubr.f32.mxu1 %v1552_v2  ;;  %v1755_v49 = vrot.slane %v34_v47, %v42_v45  ;;  %v1759_v55 = vrot.slane %v34_v47, %v38_v54  ;;  %p1535_p3 = por %p1534_p2, %p1533_p1 }
  0x12   :  { %1270 = vmatpush1.bf16.msra.mxu1 %v1691_v30 }
  0x13   :  { %1272 = vmatprep.subr.bf16.mxu1 %v1608_v6  ;;  %1318 = vmatpush1.bf16.msra.mxu0 %v1691_v30  ;;  %p1536_p4 = pnand %p1535_p3, %p1529_p0 }
  0x14   :  { %1198 = vmatmul.mubr.msk.f32.gmra.mrb[8].mxu1 %vm46_vm1, %v28_v31  ;;  %1320 = vmatprep.subr.bf16.mxu0 %v1608_v6 }
  0x15   :  { %172 = vmatprep.mubr.f32.mxu1 %v1552_v2 }
  0x18   :  { %1199 = vmatmul.mubr.msk.f32.gmra.mrb[10].mxu1 %vm46_vm1, %v29_v32 }
  0x19   :  { %178 = vmatprep.mubr.f32.mxu1 %v1552_v2 }
  0x1c   :  { %1200 = vmatmul.mubr.msk.f32.gmra.mrb[12].mxu1 %vm46_vm1, %v30_v33 }
  0x1d   :  { %184 = vmatprep.mubr.f32.mxu1 %v1552_v2 }
  0x20   :  { %1201 = vmatmul.mubr.msk.f32.gmra.mrb[14].mxu1 %vm46_vm1, %v31_v34 }
  0x21   :  { %293 = vmatprep.mubr.f32.mxu1 %v1552_v2 }
  0x24   :  { %294 = vmatmul.mubr.f32.vlgmr.msra.gmra.mrb[0].mxu1 %v1552_v2 }
  0x25   :  { %1274 = vmatpush1.bf16.msra.mxu1 %v1618_v9  ;;  %401 = vmatprep.mubr.f32.mxu1 %v1552_v2 }
  0x26   :  { %1276 = vmatprep.subr.bf16.mxu1 %v1631_v13 }
  0x29   :  { %1278 = vmatpush1.bf16.msra.mxu1 %v1640_v16 }
  0x2a   :  { %1280 = vmatprep.subr.bf16.mxu1 %v1650_v19 }
  0x2d   :  { %1282 = vmatpush1.bf16.msra.mxu1 %v1672_v25 }
  0x2e   :  { %1284 = vmatprep.subr.bf16.mxu1 %v1675_v26 }
  0x31   :  { %1286 = vmatpush1.bf16.msra.mxu1 %v1691_v30 }
  0x32   :  { %1288 = vmatprep.subr.bf16.mxu1 %v1608_v6 }
  0xe3   :  { %v1732_v35 = vpop.f32.mrb[6].mxu1 }
  0xe4   :  { %v1734_v36 = vpop.f32.mrb[7].mxu1 }
  0xe7   :  { %v1736_v37 = vpop.f32.mrb[8].mxu1 }
  0xe8   :  { %v1738_v38 = vpop.f32.mrb[9].mxu1 }
  0xeb   :  { %v1740_v40 = vpop.f32.mrb[10].mxu1 }
  0xec   :  { %v1742_v41 = vpop.f32.mrb[11].mxu1 }
  0xef   :  { %v1744_v43 = vpop.f32.mrb[12].mxu1 }
  0xf0   :  { %v1746_v44 = vpop.f32.mrb[13].mxu1 }
  0xf3   :  { %v1748_v46 = vpop.f32.mrb[14].mxu1 }
  0xf4   :  { %v1753_v48 = vpop.f32.mrb[15].mxu1 }
  0xf7   :  { %v295_v50 = vpop.f32.mrb[0].mxu1 }
  0xf8   :  { %v297_v51 = vpop.f32.mrb[1].mxu1  ;;  %v1395_v56 = vadd.f32 %v295_v50, %v1759_v55 }
  0xf9   :  { %v1396_v52 = vadd.f32 %v297_v51, %v1755_v49 }
  0xfa   :  { %v1202_v57 = vmul.f32 -1.442695, %v1395_v56 }
  0xfb   :  { %1432 = vtanh.f32 %v1396_v52  ;;  %v1203_v4 = vmul.f32 -1.442695, %v1396_v52 }
  0xfc   :  { %1434 = vpow2.f32 %v1202_v57 }
 0x105   :  { %v1433_v53 = vpop.eup %1432 }
 0x106   :  { %317 = vrot.lane.b32.xlu0 %v1433_v53, %s1553_s23  ;;  %v1435_v58 = vpop.eup %1434 }
 0x107   :  { %v308_v59 = vadd.f32 1.0, %v1435_v58 }
 0x109   :  { %1436 = vrcp.f32 %v308_v59 }
 0x113   :  { %v1437_v60 = vpop.eup %1436 }
 0x114   :  { %v315_v63 = vmul.f32 0.0, %v1437_v60 }
 0x178   :  { %v318_v61 = vpop.permute.xlu0 %317 }
 0x179   :  { %v320_v62 = vmul.f32 %v1437_v60, %v318_v61 }
 0x17b   :  { %322 = vrot.lane.b32.xlu0 %v320_v62, %s1553_s23 }
 0x1ed   :  { %v323_v0 = vpop.permute.xlu0 %322 }
 0x1ee   :  { %v325_v1 = vadd.f32 %v323_v0, %v315_v63 }
 0x1f0   :  { %1438 = vtanh.f32 %v325_v1 }
 0x1f1   :  { %1440 = vpow2.f32 %v1203_v4 }
 0x1fa   :  { %v1439_v3 = vpop.eup %1438 }
 0x1fb   :  { %328 = vrot.lane.b32.xlu1 %v1439_v3, %s1553_s23  ;;  %v1441_v5 = vpop.eup %1440 }
 0x1fc   :  { %v309_v7 = vadd.f32 1.0, %v1441_v5 }
 0x1fe   :  { %1442 = vrcp.f32 %v309_v7 }
 0x208   :  { %v1443_v8 = vpop.eup %1442 }
 0x26d   :  { %v329_v10 = vpop.permute.xlu1 %328 }
 0x26e   :  { %v331_v11 = vmul.f32 %v1443_v8, %v329_v10 }
 0x270   :  { %1204 = vmatmul.mubr.msk.f32.vlgmr.msra.gmra.mrb[2].mxu1 %vm225_vm2, %v331_v11  ;;  %v163_v11 = vadd.f32 %v1732_v35, %v1759_v55 }
 0x271   :  { %1290 = vmatpush1.bf16.msra.mxu1 %v1618_v9  ;;  %509 = vmatprep.mubr.f32.mxu1 %v1552_v2 }
 0x272   :  { %1292 = vmatprep.subr.bf16.mxu1 %v1631_v13 }
 0x275   :  { %1294 = vmatpush1.bf16.msra.mxu1 %v1640_v16 }
 0x276   :  { %1296 = vmatprep.subr.bf16.mxu1 %v1650_v19 }
 0x279   :  { %1298 = vmatpush1.bf16.msra.mxu1 %v1672_v25 }
 0x27a   :  { %1300 = vmatprep.subr.bf16.mxu1 %v1675_v26 }
 0x27d   :  { %1302 = vmatpush1.bf16.msra.mxu1 %v1691_v30 }
 0x343   :  { %v403_v12 = vpop.f32.mrb[2].mxu1 }
 0x344   :  { %v405_v14 = vpop.f32.mrb[3].mxu1  ;;  %v1397_v18 = vadd.f32 %v403_v12, %v1759_v55  ;;  %v165_v12 = vadd.f32 %v1734_v36, %v1755_v49 }
 0x345   :  { %v1398_v15 = vadd.f32 %v405_v14, %v1755_v49 }
 0x346   :  { %v1205_v20 = vmul.f32 -1.442695, %v1397_v18 }
 0x347   :  { %1444 = vtanh.f32 %v1398_v15  ;;  %v1206_v33 = vmul.f32 -1.442695, %v1398_v15 }
 0x348   :  { %1446 = vpow2.f32 %v1205_v20 }
 0x351   :  { %v1445_v17 = vpop.eup %1444 }
 0x352   :  { %425 = vrot.lane.b32.xlu1 %v1445_v17, %s1553_s23  ;;  %v1447_v21 = vpop.eup %1446 }
 0x353   :  { %v416_v22 = vadd.f32 1.0, %v1447_v21 }
 0x355   :  { %1448 = vrcp.f32 %v416_v22 }
 0x35f   :  { %v1449_v23 = vpop.eup %1448 }
 0x360   :  { %v423_v28 = vmul.f32 %v1449_v23, %v325_v1 }
 0x3c4   :  { %v426_v24 = vpop.permute.xlu1 %425 }
 0x3c5   :  { %v428_v27 = vmul.f32 %v1449_v23, %v426_v24 }
 0x3c7   :  { %430 = vrot.lane.b32.xlu0 %v428_v27, %s1553_s23 }
 0x439   :  { %v431_v29 = vpop.permute.xlu0 %430 }
 0x43a   :  { %v433_v31 = vadd.f32 %v431_v29, %v423_v28 }
 0x43c   :  { %1450 = vtanh.f32 %v433_v31 }
 0x43d   :  { %1452 = vpow2.f32 %v1206_v33 }
 0x446   :  { %v1451_v32 = vpop.eup %1450 }
 0x447   :  { %436 = vrot.lane.b32.xlu1 %v1451_v32, %s1553_s23  ;;  %v1453_v34 = vpop.eup %1452 }
 0x448   :  { %v417_v39 = vadd.f32 1.0, %v1453_v34 }
 0x44a   :  { %1454 = vrcp.f32 %v417_v39 }
 0x454   :  { %v1455_v42 = vpop.eup %1454 }
 0x4b9   :  { %v437_v45 = vpop.permute.xlu1 %436 }
 0x4ba   :  { %v439_v47 = vmul.f32 %v1455_v42, %v437_v45 }
 0x4bc   :  { %1207 = vmatmul.mubr.msk.f32.vlgmr.msra.gmra.mrb[4].mxu1 %vm225_vm2, %v439_v47  ;;  %v169_v47 = vadd.f32 %v1736_v37, %v1759_v55 }
 0x4bd   :  { %1252 = vmatprep.mubr.msk.f32.mxu1 %vm1555_vm3, %v1552_v2 }
 0x58f   :  { %v511_v50 = vpop.f32.mrb[4].mxu1 }
 0x590   :  { %v513_v51 = vpop.f32.mrb[5].mxu1  ;;  %v1399_v54 = vadd.f32 %v511_v50, %v1759_v55  ;;  %v171_v50 = vadd.f32 %v1738_v38, %v1755_v49 }
 0x591   :  { %v1400_v52 = vadd.f32 %v513_v51, %v1755_v49 }
 0x592   :  { %v1208_v56 = vmul.f32 -1.442695, %v1399_v54 }
 0x593   :  { %1456 = vtanh.f32 %v1400_v52  ;;  %v1209_v3 = vmul.f32 -1.442695, %v1400_v52 }
 0x594   :  { %1458 = vpow2.f32 %v1208_v56 }
 0x59d   :  { %v1457_v53 = vpop.eup %1456 }
 0x59e   :  { %533 = vrot.lane.b32.xlu0 %v1457_v53, %s1553_s23  ;;  %v1459_v57 = vpop.eup %1458 }
 0x59f   :  { %v524_v58 = vadd.f32 1.0, %v1459_v57 }
 0x5a1   :  { %1460 = vrcp.f32 %v524_v58 }
 0x5ab   :  { %v1461_v59 = vpop.eup %1460 }
 0x5ac   :  { %v531_v62 = vmul.f32 %v1461_v59, %v433_v31 }
 0x610   :  { %v534_v60 = vpop.permute.xlu0 %533 }
 0x611   :  { %v536_v61 = vmul.f32 %v1461_v59, %v534_v60 }
 0x613   :  { %538 = vrot.lane.b32.xlu1 %v536_v61, %s1553_s23 }
 0x685   :  { %v539_v63 = vpop.permute.xlu1 %538 }
 0x686   :  { %v541_v0 = vadd.f32 %v539_v63, %v531_v62 }
 0x688   :  { %1462 = vtanh.f32 %v541_v0 }
 0x689   :  { %1464 = vpow2.f32 %v1209_v3 }
 0x692   :  { %v1463_v1 = vpop.eup %1462 }
 0x693   :  { %544 = vrot.lane.b32.xlu0 %v1463_v1, %s1553_s23  ;;  %v1465_v4 = vpop.eup %1464 }
 0x694   :  { %v525_v5 = vadd.f32 1.0, %v1465_v4 }
 0x696   :  { %1466 = vrcp.f32 %v525_v5 }
 0x6a0   :  { %v1467_v7 = vpop.eup %1466 }
 0x705   :  { %v545_v8 = vpop.permute.xlu0 %544 }
 0x706   :  { %v547_v10 = vmul.f32 %v1467_v7, %v545_v8 }
 0x708   :  { %1210 = vmatmul.mubr.msk.f32.vlgmr.msra.gmra.mrb[0].mxu0 %vm225_vm2, %v547_v10  ;;  %v175_v10 = vadd.f32 %v1740_v40, %v1759_v55 }
 0x709   :  { %1322 = vmatpush1.bf16.msra.mxu0 %v1618_v9  ;;  %725 = vmatprep.mubr.f32.mxu0 %v1552_v2 }
 0x70a   :  { %1324 = vmatprep.subr.bf16.mxu0 %v1631_v13 }
 0x70d   :  { %1326 = vmatpush1.bf16.msra.mxu0 %v1640_v16 }
 0x70e   :  { %1328 = vmatprep.subr.bf16.mxu0 %v1650_v19 }
 0x711   :  { %1330 = vmatpush1.bf16.msra.mxu0 %v1672_v25 }
 0x712   :  { %1332 = vmatprep.subr.bf16.mxu0 %v1675_v26 }
 0x715   :  { %1334 = vmatpush1.bf16.msra.mxu0 %v1691_v30 }
 0x716   :  { %1336 = vmatprep.subr.bf16.mxu0 %v1608_v6 }
 0x7db   :  { %v619_v14 = vpop.f32.mrb[0].mxu0 }
 0x7dc   :  { %v624_v15 = vadd.f32 %v619_v14, %v163_v11  ;;  %v621_v17 = vpop.f32.mrb[1].mxu0  ;;  %v177_v11 = vadd.f32 %v1742_v41, %v1755_v49 }
 0x7dd   :  { %v625_v18 = vadd.f32 %v621_v17, %v165_v12 }
 0x7de   :  { %v1211_v21 = vmul.f32 -1.442695, %v624_v15 }
 0x7df   :  { %1468 = vtanh.f32 %v625_v18  ;;  %v1212_v32 = vmul.f32 -1.442695, %v625_v18 }
 0x7e0   :  { %1470 = vpow2.f32 %v1211_v21 }
 0x7e9   :  { %v1469_v20 = vpop.eup %1468 }
 0x7ea   :  { %641 = vrot.lane.b32.xlu1 %v1469_v20, %s1553_s23  ;;  %v1471_v22 = vpop.eup %1470 }
 0x7eb   :  { %v632_v23 = vadd.f32 1.0, %v1471_v22 }
 0x7ed   :  { %1472 = vrcp.f32 %v632_v23 }
 0x7f7   :  { %v1473_v24 = vpop.eup %1472 }
 0x7f8   :  { %v639_v35 = vmul.f32 %v1473_v24, %v541_v0 }
 0x85c   :  { %v642_v27 = vpop.permute.xlu1 %641 }
 0x85d   :  { %v644_v28 = vmul.f32 %v1473_v24, %v642_v27 }
 0x85f   :  { %646 = vrot.lane.b32.xlu0 %v644_v28, %s1553_s23 }
 0x8d1   :  { %v647_v36 = vpop.permute.xlu0 %646 }
 0x8d2   :  { %v649_v29 = vadd.f32 %v647_v36, %v639_v35 }
 0x8d4   :  { %1474 = vtanh.f32 %v649_v29 }
 0x8d5   :  { %1476 = vpow2.f32 %v1212_v32 }
 0x8de   :  { %v1475_v31 = vpop.eup %1474 }
 0x8df   :  { %652 = vrot.lane.b32.xlu1 %v1475_v31, %s1553_s23  ;;  %v1477_v33 = vpop.eup %1476 }
 0x8e0   :  { %v633_v34 = vadd.f32 1.0, %v1477_v33 }
 0x8e2   :  { %1478 = vrcp.f32 %v633_v34  ;;  %v181_v34 = vadd.f32 %v1744_v43, %v1759_v55 }
 0x8ec   :  { %v1479_v39 = vpop.eup %1478 }
 0x951   :  { %v653_v42 = vpop.permute.xlu1 %652 }
 0x952   :  { %v655_v45 = vmul.f32 %v1479_v39, %v653_v42 }
 0x954   :  { %1213 = vmatmul.mubr.msk.f32.vlgmr.msra.gmra.mrb[2].mxu0 %vm225_vm2, %v655_v45 }
 0x955   :  { %1338 = vmatpush1.bf16.msra.mxu0 %v1618_v9  ;;  %833 = vmatprep.mubr.f32.mxu0 %v1552_v2 }
 0x956   :  { %1340 = vmatprep.subr.bf16.mxu0 %v1631_v13 }
 0x959   :  { %1342 = vmatpush1.bf16.msra.mxu0 %v1640_v16 }
 0x95a   :  { %1344 = vmatprep.subr.bf16.mxu0 %v1650_v19 }
 0x95d   :  { %1346 = vmatpush1.bf16.msra.mxu0 %v1672_v25 }
 0x95e   :  { %1348 = vmatprep.subr.bf16.mxu0 %v1675_v26 }
 0x961   :  { %1350 = vmatpush1.bf16.msra.mxu0 %v1691_v30 }
 0x962   :  { %1352 = vmatprep.subr.bf16.mxu0 %v1608_v6 }
 0xa27   :  { %v727_v51 = vpop.f32.mrb[2].mxu0 }
 0xa28   :  { %v732_v52 = vadd.f32 %v727_v51, %v169_v47  ;;  %v729_v53 = vpop.f32.mrb[3].mxu0 }
 0xa29   :  { %v733_v54 = vadd.f32 %v729_v53, %v171_v50 }
 0xa2a   :  { %v1214_v57 = vmul.f32 -1.442695, %v732_v52 }
 0xa2b   :  { %1480 = vtanh.f32 %v733_v54  ;;  %v1215_v1 = vmul.f32 -1.442695, %v733_v54 }
 0xa2c   :  { %1482 = vpow2.f32 %v1214_v57 }
 0xa35   :  { %v1481_v56 = vpop.eup %1480 }
 0xa36   :  { %749 = vrot.lane.b32.xlu0 %v1481_v56, %s1553_s23  ;;  %v1483_v58 = vpop.eup %1482 }
 0xa37   :  { %v740_v59 = vadd.f32 1.0, %v1483_v58 }
 0xa39   :  { %1484 = vrcp.f32 %v740_v59 }
 0xa43   :  { %v1485_v60 = vpop.eup %1484 }
 0xa44   :  { %v747_v37 = vmul.f32 %v1485_v60, %v649_v29 }
 0xaa8   :  { %v750_v61 = vpop.permute.xlu0 %749 }
 0xaa9   :  { %v752_v62 = vmul.f32 %v1485_v60, %v750_v61  ;;  %v187_v60 = vadd.f32 %v1748_v46, %v1759_v55  ;;  %v189_v61 = vadd.f32 %v1753_v48, %v1755_v49  ;;  %v1088_v46 = vld [vmem:[%s1904_s4] sm:$0xff]  ;;  %v1089_v48 = vld [vmem:[%s1904_s4 + $0x8] sm:$0xff]  ;;  %v1554_v55 = vmov 0.0|0.0  }
 0xaaa   :  { %1383 = vmatprep.subr.bf16.mxu1 %v1554_v55 }
 0xaab   :  { %754 = vrot.lane.b32.xlu1 %v752_v62, %s1553_s23 }
 0xb1d   :  { %v755_v38 = vpop.permute.xlu1 %754 }
 0xb1e   :  { %v757_v63 = vadd.f32 %v755_v38, %v747_v37 }
 0xb20   :  { %1486 = vtanh.f32 %v757_v63 }
 0xb21   :  { %1488 = vpow2.f32 %v1215_v1 }
 0xb2a   :  { %v1487_v0 = vpop.eup %1486 }
 0xb2b   :  { %760 = vrot.lane.b32.xlu0 %v1487_v0, %s1553_s23  ;;  %v1489_v3 = vpop.eup %1488 }
 0xb2c   :  { %v741_v4 = vadd.f32 1.0, %v1489_v3 }
 0xb2e   :  { %1490 = vrcp.f32 %v741_v4 }
 0xb38   :  { %v1491_v5 = vpop.eup %1490 }
 0xb9d   :  { %v761_v7 = vpop.permute.xlu0 %760 }
 0xb9e   :  { %v763_v8 = vmul.f32 %v1491_v5, %v761_v7 }
 0xba0   :  { %1216 = vmatmul.mubr.msk.f32.vlgmr.msra.gmra.mrb[4].mxu0 %vm225_vm2, %v763_v8 }
 0xba1   :  { %1354 = vmatpush1.bf16.msra.mxu0 %v1618_v9  ;;  %941 = vmatprep.mubr.f32.mxu0 %v1552_v2 }
 0xba2   :  { %1356 = vmatprep.subr.bf16.mxu0 %v1631_v13 }
 0xba5   :  { %1358 = vmatpush1.bf16.msra.mxu0 %v1640_v16 }
 0xba6   :  { %1360 = vmatprep.subr.bf16.mxu0 %v1650_v19 }
 0xba9   :  { %1362 = vmatpush1.bf16.msra.mxu0 %v1672_v25 }
 0xbaa   :  { %1364 = vmatprep.subr.bf16.mxu0 %v1675_v26 }
 0xbad   :  { %1366 = vmatpush1.bf16.msra.mxu0 %v1691_v30 }
 0xbae   :  { %1368 = vmatprep.subr.bf16.mxu0 %v1608_v6 }
 0xc73   :  { %v835_v12 = vpop.f32.mrb[4].mxu0 }
 0xc74   :  { %v840_v14 = vadd.f32 %v835_v12, %v175_v10  ;;  %v837_v15 = vpop.f32.mrb[5].mxu0  ;;  %v1384_v10 = vpack.c.bf16 %v1089_v48, %v1088_v46 }
 0xc75   :  { %v841_v17 = vadd.f32 %v837_v15, %v177_v11  ;;  %v1091_v11 = vld [vmem:[%s1904_s4 + $0x18] sm:$0xff]  ;;  %v1093_v15 = vld [vmem:[%s1904_s4 + $0x28] sm:$0xff] }
 0xc76   :  { %v1217_v20 = vmul.f32 -1.442695, %v840_v14  ;;  %1385 = vmatpush3.bf16.msra.mxu1 %v1384_v10  ;;  %v1092_v14 = vld [vmem:[%s1904_s4 + $0x20] sm:$0xff] }
 0xc77   :  { %1492 = vtanh.f32 %v841_v17  ;;  %v1218_v35 = vmul.f32 -1.442695, %v841_v17  ;;  %1386 = vmatprep.subr.bf16.mxu1 %v1554_v55  ;;  %v1390_v17 = vpack.c.bf16 %v1093_v15, %v1092_v14 }
 0xc78   :  { %1494 = vpow2.f32 %v1217_v20  ;;  %v1095_v20 = vld [vmem:[%s1904_s4 + $0x38] sm:$0xff] }
 0xc81   :  { %v1493_v18 = vpop.eup %1492 }
 0xc82   :  { %857 = vrot.lane.b32.xlu1 %v1493_v18, %s1553_s23  ;;  %v1495_v21 = vpop.eup %1494  ;;  %v1094_v18 = vld [vmem:[%s1904_s4 + $0x30] sm:$0xff] }
 0xc83   :  { %v848_v22 = vadd.f32 1.0, %v1495_v21  ;;  %v1393_v21 = vpack.c.bf16 %v1095_v20, %v1094_v18 }
 0xc85   :  { %1496 = vrcp.f32 %v848_v22 }
 0xc8f   :  { %v1497_v6 = vpop.eup %1496 }
 0xc90   :  { %v855_v40 = vmul.f32 %v1497_v6, %v757_v63 }
 0xcf4   :  { %v858_v23 = vpop.permute.xlu1 %857 }
 0xcf5   :  { %v860_v24 = vmul.f32 %v1497_v6, %v858_v23 }
 0xcf7   :  { %862 = vrot.lane.b32.xlu0 %v860_v24, %s1553_s23 }
 0xd69   :  { %v863_v41 = vpop.permute.xlu0 %862 }
 0xd6a   :  { %v865_v27 = vadd.f32 %v863_v41, %v855_v40 }
 0xd6c   :  { %1498 = vtanh.f32 %v865_v27 }
 0xd6d   :  { %1500 = vpow2.f32 %v1218_v35 }
 0xd76   :  { %v1499_v28 = vpop.eup %1498 }
 0xd77   :  { %868 = vrot.lane.b32.xlu1 %v1499_v28, %s1553_s23  ;;  %v1501_v36 = vpop.eup %1500 }
 0xd78   :  { %v849_v29 = vadd.f32 1.0, %v1501_v36 }
 0xd7a   :  { %1502 = vrcp.f32 %v849_v29  ;;  %v1225_v29 = vld [vmem:[%s1905_s5] ss:$0 sm:$0xff] }
 0xd84   :  { %v1503_v31 = vpop.eup %1502 }
 0xde9   :  { %v869_v32 = vpop.permute.xlu1 %868 }
 0xdea   :  { %v871_v33 = vmul.f32 %v1503_v31, %v869_v32 }
 0xdec   :  { %1219 = vmatmul.mubr.msk.f32.vlgmr.msra.gmra.mrb[6].mxu0 %vm225_vm2, %v871_v33 }
 0xded   :  { %1370 = vmatpush1.bf16.msra.mxu0 %v1618_v9  ;;  %1049 = vmatprep.mubr.f32.mxu0 %v1552_v2  ;;  %v183_v9 = vadd.f32 %v1746_v44, %v1755_v49  ;;  %v1090_v49 = vld [vmem:[%s1904_s4 + $0x10] sm:$0xff] }
 0xdee   :  { %1372 = vmatprep.subr.bf16.mxu0 %v1631_v13  ;;  %v1387_v12 = vpack.c.bf16 %v1091_v11, %v1090_v49 }
 0xdf0   :  { %1388 = vmatpush3.bf16.msra.mxu1 %v1387_v12 }
 0xdf1   :  { %1374 = vmatpush1.bf16.msra.mxu0 %v1640_v16  ;;  %1389 = vmatprep.subr.bf16.mxu1 %v1554_v55 }
 0xdf2   :  { %1376 = vmatprep.subr.bf16.mxu0 %v1650_v19 }
 0xdf4   :  { %1391 = vmatpush3.bf16.msra.mxu1 %v1390_v17 }
 0xdf5   :  { %1378 = vmatpush1.bf16.msra.mxu0 %v1672_v25  ;;  %1392 = vmatprep.subr.bf16.mxu1 %v1554_v55 }
 0xdf6   :  { %1380 = vmatprep.subr.bf16.mxu0 %v1675_v26 }
 0xdf8   :  { %1394 = vmatpush3.bf16.msra.mxu1 %v1393_v21 }
 0xdf9   :  { %1382 = vmatpush1.bf16.msra.mxu0 %v1691_v30 }
 0xebf   :  { %v943_v39 = vpop.f32.mrb[6].mxu0 }
 0xec0   :  { %v948_v42 = vadd.f32 %v943_v39, %v181_v34  ;;  %v945_v45 = vpop.f32.mrb[7].mxu0 }
 0xec1   :  { %v949_v13 = vadd.f32 %v945_v45, %v183_v9 }
 0xec2   :  { %v1220_v19 = vmul.f32 -1.442695, %v948_v42 }
 0xec3   :  { %1504 = vtanh.f32 %v949_v13  ;;  %v1221_v53 = vmul.f32 -1.442695, %v949_v13 }
 0xec4   :  { %1506 = vpow2.f32 %v1220_v19 }
 0xecd   :  { %v1505_v16 = vpop.eup %1504 }
 0xece   :  { %965 = vrot.lane.b32.xlu0 %v1505_v16, %s1553_s23  ;;  %v1507_v25 = vpop.eup %1506 }
 0xecf   :  { %v956_v26 = vadd.f32 1.0, %v1507_v25 }
 0xed1   :  { %1508 = vrcp.f32 %v956_v26 }
 0xedb   :  { %v1509_v30 = vpop.eup %1508 }
 0xedc   :  { %v963_v43 = vmul.f32 %v1509_v30, %v865_v27 }
 0xf40   :  { %v966_v47 = vpop.permute.xlu0 %965 }
 0xf41   :  { %v968_v50 = vmul.f32 %v1509_v30, %v966_v47 }
 0xf43   :  { %970 = vrot.lane.b32.xlu1 %v968_v50, %s1553_s23 }
 0xfb5   :  { %v971_v44 = vpop.permute.xlu1 %970 }
 0xfb6   :  { %v973_v51 = vadd.f32 %v971_v44, %v963_v43 }
 0xfb8   :  { %1510 = vtanh.f32 %v973_v51 }
 0xfb9   :  { %1512 = vpow2.f32 %v1221_v53 }
 0xfc2   :  { %v1511_v52 = vpop.eup %1510 }
 0xfc3   :  { %976 = vrot.lane.b32.xlu0 %v1511_v52, %s1553_s23  ;;  %v1513_v54 = vpop.eup %1512 }
 0xfc4   :  { %v957_v56 = vadd.f32 1.0, %v1513_v54 }
 0xfc6   :  { %1514 = vrcp.f32 %v957_v56 }
 0xfd0   :  { %v1515_v57 = vpop.eup %1514 }
0x1035   :  { %v977_v58 = vpop.permute.xlu0 %976 }
0x1036   :  { %v979_v59 = vmul.f32 %v1515_v57, %v977_v58 }
0x1038   :  { %1222 = vmatmul.mubr.msk.f32.vlgmr.msra.gmra.mrb[8].mxu0 %vm225_vm2, %v979_v59 }
0x110b   :  { %v1051_v62 = vpop.f32.mrb[8].mxu0 }
0x110c   :  { %v1056_v37 = vadd.f32 %v1051_v62, %v187_v60  ;;  %v1053_v38 = vpop.f32.mrb[9].mxu0 }
0x110d   :  { %v1057_v63 = vadd.f32 %v1053_v38, %v189_v61 }
0x110e   :  { %v1223_v1 = vmul.f32 -1.442695, %v1056_v37 }
0x110f   :  { %1516 = vtanh.f32 %v1057_v63  ;;  %v1224_v40 = vmul.f32 -1.442695, %v1057_v63 }
0x1110   :  { %1518 = vpow2.f32 %v1223_v1 }
0x1119   :  { %v1517_v0 = vpop.eup %1516 }
0x111a   :  { %1073 = vrot.lane.b32.xlu1 %v1517_v0, %s1553_s23  ;;  %v1519_v3 = vpop.eup %1518 }
0x111b   :  { %v1064_v4 = vadd.f32 1.0, %v1519_v3 }
0x111d   :  { %1520 = vrcp.f32 %v1064_v4 }
0x1127   :  { %v1521_v5 = vpop.eup %1520 }
0x1128   :  { %v1071_v22 = vmul.f32 %v1521_v5, %v973_v51 }
0x118c   :  { %v1074_v7 = vpop.permute.xlu1 %1073 }
0x118d   :  { %v1076_v8 = vmul.f32 %v1521_v5, %v1074_v7 }
0x118f   :  { %1078 = vrot.lane.b32.xlu0 %v1076_v8, %s1553_s23 }
0x1201   :  { %v1079_v6 = vpop.permute.xlu0 %1078 }
0x1202   :  { %v1081_v23 = vadd.f32 %v1079_v6, %v1071_v22 }
0x1204   :  { %1522 = vtanh.f32 %v1081_v23 }
0x1205   :  { %1524 = vpow2.f32 %v1224_v40 }
0x120e   :  { %v1523_v24 = vpop.eup %1522 }
0x120f   :  { %1084 = vrot.lane.b32.xlu1 %v1523_v24, %s1553_s23  ;;  %v1525_v41 = vpop.eup %1524 }
0x1210   :  { %v1065_v27 = vadd.f32 1.0, %v1525_v41 }
0x1212   :  { %1526 = vrcp.f32 %v1065_v27 }
0x121c   :  { %v1527_v28 = vpop.eup %1526 }
0x1281   :  { %v1085_v35 = vpop.permute.xlu1 %1084 }
0x1282   :  { %v1087_v36 = vmul.f32 %v1527_v28, %v1085_v35 }
0x1284   :  { %1253 = vmatmul.mubr.msk.f32.vlgmr.msra.gmra.mrb[16].mxu1 %vm225_vm2, %v1087_v36 }
0x1357   :  { %v1172_v2 = vpop.f32.mrb[16].mxu1 }
0x1358   :  { %v1173_v31 = vadd.f32 %v1225_v29, %v1172_v2  ;;  %v1254_v32 = vpop.f32.mrb[17].mxu1 }
0x135a   :  { %1177 = vst.msk [vmem:[#allocation3] sm:$0xff] %vm1176_vm4, %v1173_v31 }
0x135b   :  { %1539 = shalt.err (!%p1536_p4)
}
0x135c   :  { %s1540_s19 = scalar_lea.hbm %s1906_s6, 128 }
0x135d   :  { %p1541_p5 = scmp.ne.s32.totalorder %s1906_s6, %s1540_s19  ;;  %p1544_p6 = scmp.lt.u32.totalorder %s1540_s19, %s1906_s6 }
0x135f   :  { %p1546_p7 = pnand %p1544_p6, %p1541_p5 }
0x1361   :  { %1549 = shalt.err (!%p1546_p7)
}
0x1362   :  { %1187 = dma.vmem_to_hbm [thread:$0]  %s1185_s15, 128, %s1906_s6, [#allocation4]  }
0x1363   :  { %1550 = dma.done.wait [#allocation4], 128  }
0x1364   :  { %1551 = vsyncadd [#allocation4], 4294967168 }
0x1365   :  { %1191 = vsyncpa [#allocation4], 1 }

</bundles_post_ra>
